<compile_context>
chip_gen: v6e
topology: v6e:2x2x1
jax: 0.10.0
libtpu: 0.0.40
codegen_flags: <defaults>
</compile_context>

<pallas_src>
import functools

import jax
import jax.numpy as jnp
from jax.experimental import pallas as pl
from jax.experimental.pallas import tpu as pltpu


# ---------------------------------------------------------------------------
# Single-pass kernel: whole (Nb, C, HW) sample block resident in VMEM.
# ---------------------------------------------------------------------------
def _channel_attention_kernel(x_ref, w1t_ref, w2t_ref, o_ref):
    # x_ref: (Nb, C, HW)   w1t_ref: (C, Cr)   w2t_ref: (Cr, C)   o_ref: (Nb, C, HW)
    nb, _, hw = x_ref.shape
    x = x_ref[...]

    # AdaptiveAvgPool2d(1) / AdaptiveMaxPool2d(1): whole-tile lane reductions.
    avg = jnp.sum(x.astype(jnp.float32), axis=-1) * jnp.float32(1.0 / hw)   # (Nb, C)
    mx = jnp.max(x, axis=-1).astype(jnp.float32)                            # (Nb, C)

    # Both branches + all samples share one matmul per FC layer (row form).
    pooled = jnp.concatenate([avg, mx], axis=0)                             # (2Nb, C)
    w1t = w1t_ref[...].astype(jnp.float32)                                  # (C, Cr)
    w2t = w2t_ref[...].astype(jnp.float32)                                  # (Cr, C)
    h = jnp.maximum(jnp.dot(pooled, w1t, preferred_element_type=jnp.float32), 0.0)
    o = jnp.dot(h, w2t, preferred_element_type=jnp.float32)                 # (2Nb, C)

    mask = jax.nn.sigmoid(o[:nb] + o[nb:])                                  # (Nb, C)

    # One lane-dense broadcast-multiply store for the whole tile.
    o_ref[...] = (x * mask[:, :, None].astype(x.dtype)).astype(o_ref.dtype)


# ---------------------------------------------------------------------------
# Two-pass fallback for samples that don't fit the VMEM block budget.
# ---------------------------------------------------------------------------
def _pool_kernel(x_ref, sum_ref, max_ref, *, hw_true, ts):
    # x_ref: (Nb, C, ts)   sum_ref/max_ref: (Nb, 1, C) f32, resident across the
    # spatial grid axis (same out-block index for every s).
    s = pl.program_id(1)

    @pl.when(s == 0)
    def _():
        sum_ref[...] = jnp.zeros_like(sum_ref)
        max_ref[...] = jnp.full_like(max_ref, -jnp.inf)

    x = x_ref[...]
    pos = s * ts + jax.lax.broadcasted_iota(jnp.int32, x.shape, 2)
    valid = pos < hw_true                     # mask lanes past the true H*W
    xf = x.astype(jnp.float32)
    sum_ref[...] += jnp.sum(jnp.where(valid, xf, 0.0), axis=-1)[:, None, :]
    max_ref[...] = jnp.maximum(
        max_ref[...],
        jnp.max(jnp.where(valid, xf, -jnp.inf), axis=-1)[:, None, :])


def _scale_kernel(x_ref, m_ref, o_ref):
    # x_ref: (Nb, C, ts)   m_ref: (Nb, C, 1)   o_ref: (Nb, C, ts)
    o_ref[...] = (x_ref[...] * m_ref[...].astype(x_ref.dtype)).astype(o_ref.dtype)


# ---------------------------------------------------------------------------
# Wrapper
# ---------------------------------------------------------------------------
def channel_attention(x, w1, w2, *, block_budget_bytes=8 * 1024 * 1024):
    """x: (N, C, H, W); w1: (C//ratio, C) = fc1 weight; w2: (C, C//ratio) = fc2 weight.

    Bias-free 1x1 convs, exactly as in the PyTorch module.
    """
    n, c, hgt, wid = x.shape
    cr = w1.shape[0]
    hw = hgt * wid
    itemsize = jnp.dtype(x.dtype).itemsize

    x_flat = x.reshape(n, c, hw)
    w1t = w1.T                                   # (C, Cr)  -- row-form MLP weights
    w2t = w2.T                                   # (Cr, C)
    weight_bytes = (w1.size + w2.size) * jnp.dtype(w1.dtype).itemsize

    per_sample = c * hw * itemsize

    if per_sample <= block_budget_bytes:
        # ---- single fused pass: whole samples resident in VMEM ------------
        nb = max(1, block_budget_bytes // per_sample)
        nb = min(nb, n)
        if n >= 2:
            nb = min(nb, (n + 1) // 2)           # >=2 grid steps (v7x megacore)
        grid = (pl.cdiv(n, nb),)                 # partial last batch block is OK

        block_bytes = nb * per_sample
        vmem_limit = int(min(max(4 * block_bytes + 2 * weight_bytes + (2 << 20),
                                 32 << 20), 48 << 20))
        cost = pl.CostEstimate(
            flops=int(n * (3 * c * hw + 8 * c * cr)),
            transcendentals=int(n * c),
            bytes_accessed=int(2 * n * c * hw * itemsize + 2 * weight_bytes),
        )

        out_flat = pl.pallas_call(
            _channel_attention_kernel,
            out_shape=jax.ShapeDtypeStruct((n, c, hw), x.dtype),
            grid=grid,
            in_specs=[
                pl.BlockSpec((nb, c, hw), lambda i: (i, 0, 0)),
                pl.BlockSpec((c, cr), lambda i: (0, 0)),
                pl.BlockSpec((cr, c), lambda i: (0, 0)),
            ],
            out_specs=pl.BlockSpec((nb, c, hw), lambda i: (i, 0, 0)),
            compiler_params=pltpu.CompilerParams(
                dimension_semantics=("parallel",),
                vmem_limit_bytes=vmem_limit,
            ),
            cost_estimate=cost,
        )(x_flat, w1t, w2t)
        return out_flat.reshape(n, c, hgt, wid)

    # ---- two-pass fallback: HW-blocked pooling, tiny MLP in XLA, scale ----
    nb = 1
    ts = max(128, (block_budget_bytes // (c * itemsize)) // 128 * 128)
    ts = min(ts, pl.cdiv(hw, 128) * 128)
    ns = pl.cdiv(hw, ts)
    block_bytes = nb * c * ts * itemsize
    vmem_limit = int(min(max(4 * block_bytes + (4 << 20), 32 << 20), 48 << 20))

    xsum, xmax = pl.pallas_call(
        functools.partial(_pool_kernel, hw_true=hw, ts=ts),
        out_shape=(jax.ShapeDtypeStruct((n, 1, c), jnp.float32),
                   jax.ShapeDtypeStruct((n, 1, c), jnp.float32)),
        grid=(pl.cdiv(n, nb), ns),
        in_specs=[pl.BlockSpec((nb, c, ts), lambda b, s: (b, 0, s))],
        out_specs=(pl.BlockSpec((nb, 1, c), lambda b, s: (b, 0, 0)),
                   pl.BlockSpec((nb, 1, c), lambda b, s: (b, 0, 0))),
        compiler_params=pltpu.CompilerParams(
            dimension_semantics=("parallel", "arbitrary"),
            vmem_limit_bytes=vmem_limit,
        ),
    )(x_flat)

    avg = xsum[:, 0, :] * jnp.float32(1.0 / hw)          # (N, C)
    mx = xmax[:, 0, :]                                   # (N, C)

    w1f = w1t.astype(jnp.float32)
    w2f = w2t.astype(jnp.float32)

    def _mlp(p):                                         # negligible FLOPs: plain XLA
        return jnp.maximum(p @ w1f, 0.0) @ w2f

    mask = jax.nn.sigmoid(_mlp(avg) + _mlp(mx))[:, :, None]   # (N, C, 1), f32

    out_flat = pl.pallas_call(
        _scale_kernel,
        out_shape=jax.ShapeDtypeStruct((n, c, hw), x.dtype),
        grid=(pl.cdiv(n, nb), ns),
        in_specs=[pl.BlockSpec((nb, c, ts), lambda b, s: (b, 0, s)),
                  pl.BlockSpec((nb, c, 1), lambda b, s: (b, 0, 0))],
        out_specs=pl.BlockSpec((nb, c, ts), lambda b, s: (b, 0, s)),
        compiler_params=pltpu.CompilerParams(
            dimension_semantics=("parallel", "parallel"),
            vmem_limit_bytes=vmem_limit,
        ),
    )(x_flat, mask)
    return out_flat.reshape(n, c, hgt, wid)


# ---------------------------------------------------------------------------
# Pure-JAX reference mirroring the PyTorch forward.
# ---------------------------------------------------------------------------
def channel_attention_ref(x, w1, w2):
    avg = jnp.mean(x, axis=(2, 3), keepdims=True)        # (N, C, 1, 1)
    mx = jnp.max(x, axis=(2, 3), keepdims=True)          # (N, C, 1, 1)

    def mlp(p):
        p = p[..., 0, 0]                                  # (N, C)
        h = jnp.maximum(p @ w1.T, 0.0)                    # (N, Cr)
        return (h @ w2.T)[..., None, None]                # (N, C, 1, 1)

    mask = jax.nn.sigmoid(mlp(avg) + mlp(mx))
    return x * mask


if __name__ == "__main__":
    key = jax.random.PRNGKey(0)
    k_w1, k_w2, k_x1, k_x2, k_x3 = jax.random.split(key, 5)

    # Module config: in_planes=16, ratio=4 -> Cr=4
    C, ratio = 16, 4
    Cr = C // ratio

    # torch.nn.init.normal_(std=0.01) equivalents (deterministic, synthetic)
    w1 = 0.01 * jax.random.normal(k_w1, (Cr, C), dtype=jnp.float32)
    w2 = 0.01 * jax.random.normal(k_w2, (C, Cr), dtype=jnp.float32)

    # Case 1: HW = 64 (lane dim not a multiple of 128; no host pad needed).
    x1 = jax.random.normal(k_x1, (2, C, 8, 8), dtype=jnp.float32)
    out1 = jax.block_until_ready(channel_attention(x1, w1, w2))
    ref1 = channel_attention_ref(x1, w1, w2)
    assert out1.shape == x1.shape
    assert jnp.allclose(out1, ref1, atol=1e-5, rtol=1e-5), "mismatch (case 1)"

    # Case 2: odd batch -> cdiv grid with a partial last batch block.
    x2 = jax.random.normal(k_x2, (3, C, 16, 16), dtype=jnp.float32)
    out2 = jax.block_until_ready(channel_attention(x2, w1, w2))
    ref2 = channel_attention_ref(x2, w1, w2)
    assert out2.shape == x2.shape
    assert jnp.allclose(out2, ref2, atol=1e-5, rtol=1e-5), "mismatch (case 2)"

    # Case 3: force the two-pass HW-blocked fallback with a tiny budget
    # (HW = 400 -> partial last spatial block with ts = 128, exercises masking).
    x3 = jax.random.normal(k_x3, (2, C, 20, 20), dtype=jnp.float32)
    out3 = jax.block_until_ready(
        channel_attention(x3, w1, w2, block_budget_bytes=4096))
    ref3 = channel_attention_ref(x3, w1, w2)
    assert out3.shape == x3.shape
    assert jnp.allclose(out3, ref3, atol=1e-5, rtol=1e-5), "mismatch (case 3)"

    print("KERNEL_OK")
</pallas_src>

<mosaic_0001>
module attributes {stable_mosaic.version = 11 : i64} {
  func.func @_channel_attention_kernel(%arg0: i32, %arg1: memref<1x16x64xf32, #tpu.memory_space<vmem>>, %arg2: memref<16x4xf32, #tpu.memory_space<vmem>>, %arg3: memref<4x16xf32, #tpu.memory_space<vmem>>, %arg4: memref<1x16x64xf32, #tpu.memory_space<vmem>>) attributes {dimension_semantics = [#tpu.dimension_semantics<parallel>], iteration_bounds = array<i64: 2>, scalar_prefetch = 0 : i64, scratch_operands = 0 : i64, tpu.core_type = #tpu.core_type<tc>, window_params = [{transform_indices = @transform_0, window_bounds = array<i64: 1, 16, 64>}, {pipeline_mode = #tpu.pipeline_mode<synchronous>, transform_indices = @transform_1, window_bounds = array<i64: 16, 4>}, {pipeline_mode = #tpu.pipeline_mode<synchronous>, transform_indices = @transform_2, window_bounds = array<i64: 4, 16>}, {transform_indices = @transform_3, window_bounds = array<i64: 1, 16, 64>}]} {
    %c0 = arith.constant 0 : index
    %c0_0 = arith.constant 0 : index
    %c0_1 = arith.constant 0 : index
    %0 = vector.load %arg1[%c0, %c0_0, %c0_1] : memref<1x16x64xf32, #tpu.memory_space<vmem>>, vector<1x16x64xf32>
    %cst = arith.constant dense<0.000000e+00> : vector<1x16xf32>
    %1 = vector.multi_reduction <add>, %0, %cst [2] : vector<1x16x64xf32> to vector<1x16xf32>
    %cst_2 = arith.constant 1.562500e-02 : f32
    %2 = vector.broadcast %cst_2 : f32 to vector<1x16xf32>
    %3 = arith.mulf %1, %2 : vector<1x16xf32>
    %cst_3 = arith.constant dense<0xFF800000> : vector<1x16xf32>
    %4 = vector.multi_reduction <maximumf>, %0, %cst_3 [2] : vector<1x16x64xf32> to vector<1x16xf32>
    %5 = tpu.concatenate %3, %4 in 0 : vector<1x16xf32>, vector<1x16xf32> -> vector<2x16xf32>
    %c0_4 = arith.constant 0 : index
    %c0_5 = arith.constant 0 : index
    %6 = vector.load %arg2[%c0_4, %c0_5] : memref<16x4xf32, #tpu.memory_space<vmem>>, vector<16x4xf32>
    %c0_6 = arith.constant 0 : index
    %c0_7 = arith.constant 0 : index
    %7 = vector.load %arg3[%c0_6, %c0_7] : memref<4x16xf32, #tpu.memory_space<vmem>>, vector<4x16xf32>
    %cst_8 = arith.constant dense<0.000000e+00> : vector<2x4xf32>
    %8 = tpu.matmul %5, %6, %cst_8 {dimension_numbers = #tpu.dot_dimension_numbers<[1], [0], [0], [1], [0, 0, 1, 1], [], []>} : vector<2x16xf32>, vector<16x4xf32>, vector<2x4xf32> -> vector<2x4xf32>
    %cst_9 = arith.constant 0.000000e+00 : f32
    %9 = vector.broadcast %cst_9 : f32 to vector<2x4xf32>
    %10 = arith.maximumf %8, %9 : vector<2x4xf32>
    %cst_10 = arith.constant dense<0.000000e+00> : vector<2x16xf32>
    %11 = tpu.matmul %10, %7, %cst_10 {dimension_numbers = #tpu.dot_dimension_numbers<[1], [0], [0], [1], [0, 0, 1, 1], [], []>} : vector<2x4xf32>, vector<4x16xf32>, vector<2x16xf32> -> vector<2x16xf32>
    %12 = vector.extract_strided_slice %11 {offsets = [0, 0], sizes = [1, 16], strides = [1, 1]} : vector<2x16xf32> to vector<1x16xf32>
    %13 = vector.extract_strided_slice %11 {offsets = [1, 0], sizes = [1, 16], strides = [1, 1]} : vector<2x16xf32> to vector<1x16xf32>
    %14 = arith.addf %12, %13 : vector<1x16xf32>
    %15 = arith.negf %14 : vector<1x16xf32>
    %16 = math.exp %15 : vector<1x16xf32>
    %cst_11 = arith.constant 1.000000e+00 : f32
    %17 = vector.broadcast %cst_11 : f32 to vector<1x16xf32>
    %18 = arith.addf %17, %16 : vector<1x16xf32>
    %19 = arith.divf %17, %18 : vector<1x16xf32>
    %20 = vector.shape_cast %19 : vector<1x16xf32> to vector<1x16x1xf32>
    %21 = vector.broadcast %20 : vector<1x16x1xf32> to vector<1x16x64xf32>
    %22 = arith.mulf %0, %21 : vector<1x16x64xf32>
    %c0_12 = arith.constant 0 : index
    %c0_13 = arith.constant 0 : index
    %c0_14 = arith.constant 0 : index
    %23 = vector.load %arg4[%c0_12, %c0_13, %c0_14] : memref<1x16x64xf32, #tpu.memory_space<vmem>>, vector<1x16x64xf32>
    tpu.vector_store %arg4[%c0_12, %c0_13, %c0_14], %22 {strides = array<i32>} : memref<1x16x64xf32, #tpu.memory_space<vmem>>, vector<1x16x64xf32>,
    return
  }
  func.func @transform_0(%arg0: i32) -> (i32, i32, i32) {
    %c0_i32 = arith.constant 0 : i32
    %c0_i32_0 = arith.constant 0 : i32
    %c0_i32_1 = arith.constant 0 : i32
    return %arg0, %c0_i32, %c0_i32_0 : i32, i32, i32
  }
  func.func @transform_1(%arg0: i32) -> (i32, i32) {
    %c0_i32 = arith.constant 0 : i32
    %c0_i32_0 = arith.constant 0 : i32
    %c0_i32_1 = arith.constant 0 : i32
    return %c0_i32, %c0_i32_0 : i32, i32
  }
  func.func @transform_2(%arg0: i32) -> (i32, i32) {
    %c0_i32 = arith.constant 0 : i32
    %c0_i32_0 = arith.constant 0 : i32
    %c0_i32_1 = arith.constant 0 : i32
    return %c0_i32, %c0_i32_0 : i32, i32
  }
  func.func @transform_3(%arg0: i32) -> (i32, i32, i32) {
    %c0_i32 = arith.constant 0 : i32
    %c0_i32_0 = arith.constant 0 : i32
    %c0_i32_1 = arith.constant 0 : i32
    return %arg0, %c0_i32, %c0_i32_0 : i32, i32, i32
  }
}

</mosaic_0001>

<bundles_post_ra>
// kernel: tpu_custom_call.1
= control target key start
LH: loop header
LB: loop body
LE: loop exit
PB: predicated region body
PF: predicated region fallthrough
CT: control target
= control target key end

     0   :  { %8 = vsyncpa [#allocation3], 0  ;;  %s902_s0 = inlined_call_operand.hbm [shape: f32[2,16,64], index: 0, kind: input, shape index: {}]   ;;  %s903_s1 = inlined_call_operand.vmem [shape: f32[16,4], index: 1, kind: input, shape index: {}]   ;;  %s904_s2 = inlined_call_operand.vmem [shape: f32[4,16], index: 2, kind: input, shape index: {}]   ;;  %s905_s3 = inlined_call_operand.hbm [shape: f32[2,16,64], index: 3, kind: output, shape index: {}]  }
   0x1   :  { %10 = vsyncpa [#allocation3 + $0x1], 0 }
   0x2   :  { %11 = vsyncpa [#allocation4], 0 }
   0x3   :  { %13 = vsyncpa [#allocation4 + $0x1], 0  ;;  %s719_s12 = smov 0   ;;  %s721_s13 = smov 0  }
   0x4   :  { %s723_s14 = smov 0   ;;  %s725_s15 = smov 0  }
   0x5 LB: > { %s740_s16 = sadd.s32 4294967295, %s689_s15   ;;  %s504_s17 = sadd.s32 4294967294, %s689_s15   ;;  %s689_s15 = sphi %s725_s15, %s920_s15   ;;  %s685_s14 = sphi %s723_s14, %s919_s14   ;;  %s681_s13 = sphi %s721_s13, %s918_s13   ;;  %s677_s12 = sphi %s719_s12, %s917_s12  }
   0x6   : > { %s744_s18 = sadd.s32 1, %s689_s15   ;;  %s26_s19 = sadd.s32 1, %s685_s14 }
   0x7   : > { %s23_s20 = ssub.s32 %s689_s15, %s744_s18  ;;  %p33_p0 = scmp.ne.s32.totalorder %s685_s14, %s681_s13 }
   0x8   : > { %p24_p1 = scmp.eq.s32.totalorder %s23_s20, 0  ;;  %p34_p2 = scmp.eq.s32.totalorder %s689_s15, 0 }
   0x9   : > { %p39_p3 = scmp.ne.s32.totalorder %s681_s13, %s677_s12  ;;  %p40_p4 = scmp.eq.s32.totalorder %s740_s16, 0 }
   0xa   : > { %s756_s21 = scalar_select %p24_p1, %s685_s14, %s26_s19  }
   0xb   : > { %p758_p5 = por %p34_p2, %p33_p0  ;;  %p762_p6 = por %p40_p4, %p39_p3 }
   0xc   : > { %p105_p7 = scmp.eq.s32.totalorder %s740_s16, 1  ;;  %p111_p8 = scmp.eq.s32.totalorder %s504_s17, 1 }
   0xd   : > { %s909_s23 = scalar_select %p762_p6, 1, 0 }
   0xe   : > { %p553_p10 = scmp.lt.s32.totalorder %s689_s15, 2  ;;  %p769_p11 = por %p105_p7, %p33_p0 }
   0xf   : > { %p773_p12 = por %p111_p8, %p39_p3  ;;  %s137_s26 = sand.u32 1, %s685_s14  }
  0x10   : > { %s910_s24 = scalar_select %p769_p11, 1, 0 }
  0x11   : > { %s911_s25 = scalar_select %p773_p12, 1, 0 }
  0x12   : > { %s522_s27 = sshll.u32 %s689_s15, 8  ;;  %s507_s28 = sshll.u32 %s137_s26, 4 }
  0x13   : > { %s782_s4 = scalar_lea.hbm %s902_s0, %s522_s27  ;;  %s141_s5 = scalar_lea.vmem [#allocation2], %s507_s28 }
  0x14   : > { %s148_s6 = sshll.u32 %s141_s5, 4  ;;  %p786_p13 = pnand %p553_p10, %p758_p5  ;;  %s790_s6 = int_to_ptr.vmem [resolvable:$true] %s148_s6 }
  0x15   : > { %s792_s8 = scalar_lea.sflag [#allocation3], %s137_s26  ;;  %s597_s9 = scalar_lea.hbm %s782_s4, 256 }
  0x16   : > { %p598_p0 = scmp.ne.s32.totalorder %s782_s4, %s597_s9  ;;  %p599_p1 = pneg %p786_p13 }
  0x17   : > { %s602_s17 = scalar_lea.hbm %s902_s0, 512  ;;  %p603_p4 = scmp.lt.s32.totalorder %s782_s4, %s902_s0 }
  0x18   : > { %p600_p2 = pnand %p599_p1, %p598_p0  ;;  %p604_p5 = scmp.lt.s32.totalorder %s602_s17, %s597_s9 }
  0x1a   : > { %p601_p3 = pneg %p600_p2  ;;  %p605_p7 = por %p604_p5, %p603_p4 }
  0x1c   : > { %p606_p8 = pnand %p605_p7, %p601_p3 }
  0x1e   : > { %609 = shalt.err (!%p606_p8)
}
  0x1f   : > { %s610_s22 = scalar_lea.vmem %s790_s6, 256  ;;  %s691_s26 = smov [#allocation2]  }
  0x20   : > { %p611_p10 = scmp.ne.s32.totalorder %s790_s6, %s610_s22  ;;  %s615_s27 = sshll.u32 %s691_s26, 4  ;;  %s616_s27 = int_to_ptr.vmem [resolvable:$false] %s615_s27 }
  0x21   : > { %s617_s28 = scalar_lea.vmem %s616_s27, 512  ;;  %p618_p2 = scmp.lt.s32.totalorder %s790_s6, %s616_s27 }
  0x22   : > { %p613_p9 = pnand %p611_p10, %p599_p1  ;;  %p619_p12 = scmp.lt.s32.totalorder %s617_s28, %s610_s22 }
  0x24   : > { %p614_p0 = pneg %p613_p9  ;;  %p620_p11 = por %p619_p12, %p618_p2 }
  0x26   : > { %p621_p6 = pnand %p620_p11, %p614_p0 }
  0x28   : > { %624 = shalt.err (!%p621_p6)
}
  0x29   : > { %s692_s29 = smov 128   ;;  %s693_s30 = smov 8  }
  0x2a   : > { %548 = dma.hbm_to_vmem [thread:$0]  (!%p786_p13), %s782_s4, 256, %s790_s6, %s792_s8, %s692_s29, %s692_s29, %s693_s30  }
  0x2b   : > { %p510_p9 = scmp.ge.s32.totalorder %s689_s15, 1  ;;  %p156_p1 = scmp.lt.s32.totalorder %s689_s15, 3 }
  0x2d   : > { %p157_p3 = pnand %p510_p9, %p156_p1 }
  0x2e   : > { %s816_s5 = sand.u32 (!%p157_p3), 1, %s681_s13   ;;  %p913_p6 = scmp.ne.s32.totalorder (!%p157_p3), %s909_s23, 0 }
  0x2f   : > { %160 = sbr.rel (%p157_p3) target bundleno = 760 (0x2f8), region = 32  ;;  %s511_s9 = sshll.u32 (!%p157_p3), %s816_s5, 4 }
  0x30   : > { %s163_s10 = scalar_lea.sflag (!%p157_p3), [#allocation3], %s816_s5  ;;  %s166_s11 = scalar_lea.vmem (!%p157_p3), [#allocation2], %s511_s9 }
  0x34   : > { %668 = dma.done.wait (%p913_p6), %s163_s10, 256  }
  0x35   : > { %670 = vsyncadd (%p913_p6), %s163_s10, 4294967040  ;;  %vm191_vm0 = vcmask 523264   ;;  %v826_v0 = vld [vmem:[%s166_s11] sm:$0xff]  ;;  %v828_v1 = vld [vmem:[%s166_s11 + $0x8] sm:$0xff]  ;;  %v694_v6 = vmov 0.0   ;;  %vm695_vm1 = vmmov 0   ;;  %v208_v9 = vlaneseq }
  0x36   : > { %v200_v2 = vsel %vm191_vm0, %v826_v0, -inf  ;;  %v192_v3 = vsel %vm191_vm0, %v826_v0, 0.0  ;;  %v203_v4 = vsel %vm191_vm0, %v828_v1, -inf  ;;  %v195_v5 = vsel %vm191_vm0, %v828_v1, 0.0  ;;  %529 = vmatprep.subr.mxu0 %v694_v6  ;;  %v237_v7 = vld [vmem:[%s903_s1 + $0x8] sm:$0xff]  ;;  %v236_v8 = vld [vmem:[%s903_s1] sm:$0xff]  ;;  %536 = vmatprep.subr.mxu1 %v694_v6 }
  0x37   : > { %201 = vmax.xlane.f32.xlu1 %v200_v2  ;;  %193 = vadd.xlane.f32.xlu0 %v192_v3  ;;  %v209_v10 = vand.u32 127, %v208_v9  ;;  %v211_v12 = vshrl.u32 %v208_v9, 7  ;;  %vm219_vm2 = vcmask 130112   ;;  %vm234_vm3 = vcmask 1040384   ;;  %v238_v28 = vld [vmem:[%s904_s2] sm:$0xf] }
  0x38   : > { %530 = vmatpush3.msra.mxu0 %v237_v7  ;;  %533 = vmatprep.mubr.msk.f32.mxu0 %vm695_vm1, %v694_v6  ;;  %vm239_vm4 = vcmask 130048   ;;  %vm318_vm5 = vcmask 1043456   ;;  %vm314_vm6 = vcmask 31744   ;;  %s188_s19 = scalar_lea.vmem [#allocation5], %s511_s9  ;;  %s523_s22 = sshll.u32 %s740_s16, 8 }
  0x39   : > { %531 = vmatprep.subr.mxu0 %v694_v6  ;;  %538 = vmatprep.mubr.msk.f32.mxu1 %vm695_vm1, %v694_v6  ;;  %v214_v11 = vadd.s32 4294967288, %v209_v10  ;;  %v212_v16 = vsub.s32 %v209_v10, %v211_v12  ;;  %v404_v39 = vsub.s32 0, %v211_v12  ;;  %s431_s20 = sshll.u32 %s188_s19, 4  ;;  %s855_s28 = scalar_lea.hbm %s905_s3, %s523_s22  ;;  %s850_s20 = int_to_ptr.vmem [resolvable:$true] %s431_s20 }
  0x3a   : > { %532 = vmatpush3.msra.mxu0 %v236_v8  ;;  %537 = vmatpush3.msk.msra.mxu1 %vm318_vm5, %v238_v28  ;;  %s418_s16 = scalar_lea.sflag [#allocation4], %s816_s5  ;;  %s625_s29 = scalar_lea.vmem %s850_s20, 256 }
  0x3b   : > { %204 = vmax.xlane.f32.xlu1 %v203_v4  ;;  %196 = vadd.xlane.f32.xlu0 %v195_v5  ;;  %v217_v15 = vsub.s32 %v214_v11, %v211_v12  ;;  %p626_p11 = scmp.ne.s32.totalorder %s850_s20, %s625_s29  ;;  %p914_p12 = scmp.ne.s32.totalorder %s910_s24, 0 }
  0x3c   : > { %s696_s30 = smov [#allocation5]  }
  0x3d   : > { %p627_p13 = pnand %p626_p11, %p914_p12  ;;  %s629_s9 = sshll.u32 %s696_s30, 4  ;;  %s630_s9 = int_to_ptr.vmem [resolvable:$false] %s629_s9 }
  0x3e   : > { %s631_s10 = scalar_lea.vmem %s630_s9, 512  ;;  %p632_p5 = scmp.lt.s32.totalorder %s850_s20, %s630_s9 }
  0x3f   : > { %p628_p4 = pneg %p627_p13  ;;  %p633_p7 = scmp.lt.s32.totalorder %s631_s10, %s625_s29 }
  0x41   : > { %p634_p8 = por %p633_p7, %p632_p5 }
  0x43   : > { %p635_p10 = pnand %p634_p8, %p628_p4 }
  0xc0   : > { %v202_v13 = vpop.xlane.xlu1 %201  ;;  %v194_v14 = vpop.xlane.xlu0 %193 }
  0xc1   : > { %v198_v17 = vmul.f32 0.015625, %v194_v14  ;;  %v227_v22 = vrot.slane %v202_v13, %v212_v16 }
  0xc3   : > { %v213_v23 = vrot.slane %v198_v17, %v212_v16 }
  0xc4   : > { %v205_v18 = vpop.xlane.xlu1 %204  ;;  %v197_v19 = vpop.xlane.xlu0 %196 }
  0xc5   : > { %v231_v20 = vrot.slane %v205_v18, %v217_v15  ;;  %v199_v21 = vmul.f32 0.015625, %v197_v19 }
  0xc7   : > { %v218_v24 = vrot.slane %v199_v21, %v217_v15  ;;  %v232_v25 = vsel %vm219_vm2, %v231_v20, %v227_v22 }
  0xc9   : > { %v220_v26 = vsel %vm219_vm2, %v218_v24, %v213_v23 }
  0xca   : > { %v235_v27 = vsel %vm234_vm3, %v220_v26, %v232_v25 }
  0xcb   : > { %534 = vmatmul.mubr.msk.f32.vlgmr.msra.gmra.mxu0 %vm239_vm4, %v235_v27 }
 0x18b   : > { %v309_v29 = vpop.f32.mrf.mxu0 }
 0x18c   : > { %v313_v30 = vmax.f32 %v309_v29, 0.0 }
 0x18d   : > { %v535_v31 = vpop.f32.mrf.mxu0 }
 0x18e   : > { %539 = vmatmul.mubr.msk.f32.vlgmr.msra.gmra.mxu1 %vm314_vm6, %v313_v30 }
 0x24e   : > { %v388_v32 = vpop.f32.mrf.mxu1 }
 0x24f   : > { %v393_v33 = vrot.slane %v388_v32, 1 }
 0x250   : > { %v540_v34 = vpop.f32.mrf.mxu1 }
 0x251   : > { %v395_v35 = vadd.f32 %v393_v33, %v388_v32 }
 0x253   : > { %v516_v36 = vmul.f32 -1.442695, %v395_v35 }
 0x255   : > { %593 = vpow2.f32 %v516_v36 }
 0x262   : > { %v594_v37 = vpop.eup %593 }
 0x263   : > { %v399_v38 = vadd.f32 1.0, %v594_v37 }
 0x265   : > { %595 = vrcp.f32 %v399_v38 }
 0x272   : > { %v596_v40 = vpop.eup %595 }
 0x273   : > { %v405_v41 = vrot.slane %v596_v40, %v404_v39 }
 0x275   : > { %411 = vbcast.lane.b32.xlu1 %v405_v41, 264  ;;  %407 = vbcast.lane.b32.xlu0 %v405_v41, 256 }
 0x2e7   : > { %v412_v42 = vpop.permute.xlu1 %411  ;;  %v408_v43 = vpop.permute.xlu0 %407 }
 0x2e8   : > { %v414_v44 = vmul.f32 %v412_v42, %v828_v1  ;;  %v413_v45 = vmul.f32 %v408_v43, %v826_v0 }
 0x2ea   : > { %416 = vst.msk [vmem:[%s188_s19 + $0x8] sm:$0xff] %vm191_vm0, %v414_v44  ;;  %415 = vst.msk [vmem:[%s188_s19] sm:$0xff] %vm191_vm0, %v413_v45 }
 0x2eb   : > { %638 = shalt.err (!%p635_p10)
}
 0x2ec   : > { %s639_s11 = scalar_lea.hbm %s855_s28, 256  ;;  %s643_s6 = scalar_lea.hbm %s905_s3, 512 }
 0x2ed   : > { %p640_p0 = scmp.ne.s32.totalorder %s855_s28, %s639_s11  ;;  %p644_p1 = scmp.lt.s32.totalorder %s855_s28, %s905_s3 }
 0x2ee   : > { %p645_p3 = scmp.lt.s32.totalorder %s643_s6, %s639_s11 }
 0x2ef   : > { %p641_p2 = pnand %p640_p0, %p914_p12 }
 0x2f0   : > { %p646_p6 = por %p645_p3, %p644_p1 }
 0x2f1   : > { %p642_p9 = pneg %p641_p2 }
 0x2f3   : > { %p647_p11 = pnand %p646_p6, %p642_p9 }
 0x2f5   : > { %650 = shalt.err (!%p647_p11)
}
 0x2f6   : > { %s697_s17 = smov 128   ;;  %s698_s19 = smov 8  }
 0x2f7   : > { %543 = dma.vmem_to_hbm [thread:$0]  (%p914_p12), %s850_s20, 256, %s855_s28, %s418_s16, %s697_s17, %s697_s17, %s698_s19  }
 0x2f8 PF: > { %s446_s22 = sand.u32 1, %s677_s12   ;;  %p915_p13 = scmp.ne.s32.totalorder %s911_s25, 0 }
 0x2f9   : > { %p916_p4 = scmp.ge.s32.totalorder %s689_s15, 2  ;;  %s447_s26 = scalar_lea.sflag [#allocation4], %s446_s22 }
 0x2fb   : > { %p550_p5 = pnand %p916_p4, %p915_p13 }
 0x2fd   : > { %p551_p7 = pneg %p550_p5 }
 0x2ff   : > { %672 = dma.done.wait (%p551_p7), %s447_s26, 256  }
 0x300   : > { %674 = vsyncadd (%p551_p7), %s447_s26, 4294967040  ;;  %p16_p8 = scmp.ge.s32.totalorder %s744_s18, 4   ;;  %s917_s12 = smov %s681_s13 }
 0x301   : > { %s918_s13 = smov %s685_s14  ;;  %s919_s14 = smov %s756_s21 }
 0x302   : > { %s920_s15 = smov %s744_s18  ;;  %18 = sbr.rel (!%p16_p8) target bundleno = 5 (0x5), region = 77 }
 0x307   :  { %452 = vsyncpa [#allocation3], 1 }
 0x308   :  { %454 = vsyncpa [#allocation3 + $0x1], 1 }
 0x309   :  { %455 = vsyncpa [#allocation4], 1 }
 0x30a   :  { %457 = vsyncpa [#allocation4 + $0x1], 1 }

</bundles_post_ra>
